<compile_context>
chip_gen: v7x
topology: tpu7x:2x2x1
jax: 0.10.0
libtpu: 0.0.40
codegen_flags: <defaults>
</compile_context>

<pallas_src>
import math
import jax
import jax.numpy as jnp
from jax import lax
from jax.experimental import pallas as pl
from jax.experimental.pallas import tpu as pltpu

B = 2          # batch
T = 8          # context_length / num_tokens
E = 32         # d_in == d_out
H = 4          # num_heads
DH = E // H    # head_dim

NEG_BIG = -1e30                      # Python float -> literal, never a captured constant
INV_SQRT_DH = 1.0 / math.sqrt(DH)    # Python float -> literal


def mha_kernel(x_ref, wqkv_ref, wo_ref, bo_ref, o_ref):
    # x: (B*T, E) -- all batch rows in a single block / single grid step.
    x = x_ref[...].astype(jnp.float32)

    # Fused QKV projection: one (B*T, E) @ (E, 3E) matmul instead of three.
    qkv = jnp.dot(x, wqkv_ref[...], preferred_element_type=jnp.float32)   # (B*T, 3E)
    wo = wo_ref[...]                                                      # (E, E)

    # Causal mask (True -> masked), built once, already batched over B.
    row = lax.broadcasted_iota(jnp.int32, (B, T, T), 1)
    col = lax.broadcasted_iota(jnp.int32, (B, T, T), 2)
    causal = col > row                                                    # matches triu(diag=1)

    # Seed the accumulator with the broadcast out-projection bias (traced value,
    # so nothing concrete is closed over); also folds the final bias add.
    acc = jnp.broadcast_to(bo_ref[...], (B * T, E)).astype(jnp.float32)

    # Static unroll over heads; every contraction is batched over B
    # (single leading batch dim -> canonical TPU dot_general, no 4-D relayouts).
    for h in range(H):
        q = qkv[:, 0 * E + h * DH: 0 * E + (h + 1) * DH].reshape(B, T, DH)
        k = qkv[:, 1 * E + h * DH: 1 * E + (h + 1) * DH].reshape(B, T, DH)
        v = qkv[:, 2 * E + h * DH: 2 * E + (h + 1) * DH].reshape(B, T, DH)

        s = jnp.einsum("bqd,bkd->bqk", q, k,
                       preferred_element_type=jnp.float32) * INV_SQRT_DH  # (B, T, T)
        s = jnp.where(causal, NEG_BIG, s)
        s = s - jnp.max(s, axis=-1, keepdims=True)
        p = jnp.exp(s)
        p = p * pl.reciprocal(jnp.sum(p, axis=-1, keepdims=True), approx=True)
        # NOTE: attention dropout is identity (drop_rate = 0.0 / eval).

        ctx = jnp.einsum("bqk,bkd->bqd", p, v,
                         preferred_element_type=jnp.float32)              # (B, T, DH)
        # Head-sliced out-projection accumulation == concat(heads) @ Wo, without lane concat.
        acc = acc + jnp.dot(ctx.reshape(B * T, DH), wo[h * DH:(h + 1) * DH, :],
                            preferred_element_type=jnp.float32)

    o_ref[...] = acc.astype(o_ref.dtype)


def multi_head_attention(x, params):
    """x: (B, T, E) float32. params: wq/wk/wv/wo stored pre-transposed as (in, out); bo: (1, E)."""
    b, t, e = x.shape
    x2d = x.reshape(b * t, e)
    # Fuse the three projection weights in the wrapper (done once by XLA).
    wqkv = jnp.concatenate([params["wq"], params["wk"], params["wv"]], axis=1)   # (E, 3E)

    out2d = pl.pallas_call(
        mha_kernel,
        out_shape=jax.ShapeDtypeStruct((b * t, e), x.dtype),
        grid_spec=pltpu.PrefetchScalarGridSpec(
            num_scalar_prefetch=0,
            grid=(1,),                      # single step: the whole problem fits in VMEM
            in_specs=[
                pl.BlockSpec((b * t, e), lambda i: (0, 0)),      # x
                pl.BlockSpec((e, 3 * e), lambda i: (0, 0)),      # fused Wqkv
                pl.BlockSpec((e, e), lambda i: (0, 0)),          # Wo
                pl.BlockSpec((1, e), lambda i: (0, 0)),          # bo
            ],
            out_specs=pl.BlockSpec((b * t, e), lambda i: (0, 0)),
        ),
        compiler_params=pltpu.CompilerParams(
            dimension_semantics=("arbitrary",),   # don't shard a 1-step grid across cores
        ),
    )(x2d, wqkv, params["wo"], params["bo"])
    return out2d.reshape(b, t, e)


def reference_mha(x, p):
    """Pure-JAX reference mirroring the PyTorch forward (dropout = identity)."""
    b, t, e = x.shape
    q = x @ p["wq"]
    k = x @ p["wk"]
    v = x @ p["wv"]
    q = q.reshape(b, t, H, DH).transpose(0, 2, 1, 3)
    k = k.reshape(b, t, H, DH).transpose(0, 2, 1, 3)
    v = v.reshape(b, t, H, DH).transpose(0, 2, 1, 3)
    s = jnp.einsum("bhqd,bhkd->bhqk", q, k)
    mask = jnp.triu(jnp.ones((t, t), bool), k=1)
    s = jnp.where(mask, -jnp.inf, s) / math.sqrt(DH)
    w = jax.nn.softmax(s, axis=-1)
    ctx = jnp.einsum("bhqk,bhkd->bhqd", w, v).transpose(0, 2, 1, 3).reshape(b, t, e)
    return ctx @ p["wo"] + p["bo"][0]


def make_params(key):
    ks = jax.random.split(key, 5)
    std = 0.02
    return dict(
        wq=jax.random.normal(ks[0], (E, E), jnp.float32) * std,   # qkv_bias=False
        wk=jax.random.normal(ks[1], (E, E), jnp.float32) * std,
        wv=jax.random.normal(ks[2], (E, E), jnp.float32) * std,
        wo=jax.random.normal(ks[3], (E, E), jnp.float32) * std,   # out_proj weight (in, out)
        bo=jax.random.normal(ks[4], (1, E), jnp.float32) * std,   # out_proj bias
    )


if __name__ == "__main__":
    key = jax.random.PRNGKey(0)
    kx, kp = jax.random.split(key)
    x = jax.random.normal(kx, (B, T, E), jnp.float32)
    params = make_params(kp)

    out = multi_head_attention(x, params)
    out = jax.block_until_ready(out)

    ref = reference_mha(x, params)
    assert out.shape == (B, T, E)
    # approx-reciprocal softmax (EUP vrcp) -> slightly looser tolerance than exact f32 divide
    assert jnp.allclose(out, ref, rtol=5e-3, atol=1e-3), "mismatch vs reference"
    print("KERNEL_OK")
</pallas_src>

<mosaic_0001>
module attributes {stable_mosaic.version = 11 : i64} {
  func.func @mha_kernel(%arg0: i32, %arg1: memref<16x32xf32, #tpu.memory_space<vmem>>, %arg2: memref<32x96xf32, #tpu.memory_space<vmem>>, %arg3: memref<32x32xf32, #tpu.memory_space<vmem>>, %arg4: memref<1x32xf32, #tpu.memory_space<vmem>>, %arg5: memref<16x32xf32, #tpu.memory_space<vmem>>) attributes {dimension_semantics = [#tpu.dimension_semantics<arbitrary>], iteration_bounds = array<i64: 1>, scalar_prefetch = 0 : i64, scratch_operands = 0 : i64, tpu.core_type = #tpu.core_type<tc>, window_params = [{pipeline_mode = #tpu.pipeline_mode<synchronous>, transform_indices = @transform_0, window_bounds = array<i64: 16, 32>}, {pipeline_mode = #tpu.pipeline_mode<synchronous>, transform_indices = @transform_1, window_bounds = array<i64: 32, 96>}, {pipeline_mode = #tpu.pipeline_mode<synchronous>, transform_indices = @transform_2, window_bounds = array<i64: 32, 32>}, {pipeline_mode = #tpu.pipeline_mode<synchronous>, transform_indices = @transform_3, window_bounds = array<i64: 1, 32>}, {pipeline_mode = #tpu.pipeline_mode<synchronous>, transform_indices = @transform_4, window_bounds = array<i64: 16, 32>}]} {
    %c0 = arith.constant 0 : index
    %c0_0 = arith.constant 0 : index
    %0 = vector.load %arg1[%c0, %c0_0] : memref<16x32xf32, #tpu.memory_space<vmem>>, vector<16x32xf32>
    %c0_1 = arith.constant 0 : index
    %c0_2 = arith.constant 0 : index
    %1 = vector.load %arg2[%c0_1, %c0_2] : memref<32x96xf32, #tpu.memory_space<vmem>>, vector<32x96xf32>
    %cst = arith.constant dense<0.000000e+00> : vector<16x96xf32>
    %2 = tpu.matmul %0, %1, %cst {dimension_numbers = #tpu.dot_dimension_numbers<[1], [0], [0], [1], [0, 0, 1, 1], [], []>} : vector<16x32xf32>, vector<32x96xf32>, vector<16x96xf32> -> vector<16x96xf32>
    %c0_3 = arith.constant 0 : index
    %c0_4 = arith.constant 0 : index
    %3 = vector.load %arg3[%c0_3, %c0_4] : memref<32x32xf32, #tpu.memory_space<vmem>>, vector<32x32xf32>
    %4 = tpu.iota {dimensions = array<i32: 1>} : vector<2x8x8xi32>
    %5 = tpu.iota {dimensions = array<i32: 2>} : vector<2x8x8xi32>
    %6 = arith.cmpi sgt, %5, %4 : vector<2x8x8xi32>
    %c0_5 = arith.constant 0 : index
    %c0_6 = arith.constant 0 : index
    %7 = vector.load %arg4[%c0_5, %c0_6] : memref<1x32xf32, #tpu.memory_space<vmem>>, vector<1x32xf32>
    %8 = vector.shape_cast %7 : vector<1x32xf32> to vector<1x32xf32>
    %9 = vector.broadcast %8 : vector<1x32xf32> to vector<16x32xf32>
    %10 = vector.extract_strided_slice %2 {offsets = [0, 0], sizes = [16, 8], strides = [1, 1]} : vector<16x96xf32> to vector<16x8xf32>
    %11 = vector.shape_cast %10 : vector<16x8xf32> to vector<2x8x8xf32>
    %12 = vector.extract_strided_slice %2 {offsets = [0, 32], sizes = [16, 8], strides = [1, 1]} : vector<16x96xf32> to vector<16x8xf32>
    %13 = vector.shape_cast %12 : vector<16x8xf32> to vector<2x8x8xf32>
    %14 = vector.extract_strided_slice %2 {offsets = [0, 64], sizes = [16, 8], strides = [1, 1]} : vector<16x96xf32> to vector<16x8xf32>
    %15 = vector.shape_cast %14 : vector<16x8xf32> to vector<2x8x8xf32>
    "tpu.trace_start"() <{level = 10 : i32, message = "bqd,bkd->bqk"}> : () -> ()
    %cst_7 = arith.constant dense<0.000000e+00> : vector<2x8x8xf32>
    %16 = tpu.matmul %11, %13, %cst_7 {dimension_numbers = #tpu.dot_dimension_numbers<[2], [2], [1], [1], [0, 0, 0, 1, 1, 1], [0], [0]>} : vector<2x8x8xf32>, vector<2x8x8xf32>, vector<2x8x8xf32> -> vector<2x8x8xf32>
    "tpu.trace_stop"() : () -> ()
    %cst_8 = arith.constant 0.353553385 : f32
    %17 = vector.broadcast %cst_8 : f32 to vector<2x8x8xf32>
    %18 = arith.mulf %16, %17 : vector<2x8x8xf32>
    %cst_9 = arith.constant -1.000000e+30 : f32
    %19 = vector.broadcast %cst_9 : f32 to vector<2x8x8xf32>
    %20 = arith.select %6, %19, %18 : vector<2x8x8xi1>, vector<2x8x8xf32>
    %cst_10 = arith.constant dense<0xFF800000> : vector<2x8xf32>
    %21 = vector.multi_reduction <maximumf>, %20, %cst_10 [2] : vector<2x8x8xf32> to vector<2x8xf32>
    %22 = vector.shape_cast %21 : vector<2x8xf32> to vector<2x8x1xf32>
    %23 = vector.broadcast %22 : vector<2x8x1xf32> to vector<2x8x8xf32>
    %24 = arith.subf %20, %23 : vector<2x8x8xf32>
    %25 = math.exp %24 : vector<2x8x8xf32>
    %cst_11 = arith.constant dense<0.000000e+00> : vector<2x8xf32>
    %26 = vector.multi_reduction <add>, %25, %cst_11 [2] : vector<2x8x8xf32> to vector<2x8xf32>
    %27 = vector.shape_cast %26 : vector<2x8xf32> to vector<2x8x1xf32>
    %28 = tpu.reciprocal %27 {approx = true} : vector<2x8x1xf32> -> vector<2x8x1xf32>
    %29 = vector.broadcast %28 : vector<2x8x1xf32> to vector<2x8x8xf32>
    %30 = arith.mulf %25, %29 : vector<2x8x8xf32>
    "tpu.trace_start"() <{level = 10 : i32, message = "bqk,bkd->bqd"}> : () -> ()
    %cst_12 = arith.constant dense<0.000000e+00> : vector<2x8x8xf32>
    %31 = tpu.matmul %30, %15, %cst_12 {dimension_numbers = #tpu.dot_dimension_numbers<[2], [1], [1], [2], [0, 0, 0, 1, 1, 2], [0], [0]>} : vector<2x8x8xf32>, vector<2x8x8xf32>, vector<2x8x8xf32> -> vector<2x8x8xf32>
    "tpu.trace_stop"() : () -> ()
    %32 = vector.shape_cast %31 : vector<2x8x8xf32> to vector<16x8xf32>
    %33 = vector.extract_strided_slice %3 {offsets = [0, 0], sizes = [8, 32], strides = [1, 1]} : vector<32x32xf32> to vector<8x32xf32>
    %cst_13 = arith.constant dense<0.000000e+00> : vector<16x32xf32>
    %34 = tpu.matmul %32, %33, %cst_13 {dimension_numbers = #tpu.dot_dimension_numbers<[1], [0], [0], [1], [0, 0, 1, 1], [], []>} : vector<16x8xf32>, vector<8x32xf32>, vector<16x32xf32> -> vector<16x32xf32>
    %35 = arith.addf %9, %34 : vector<16x32xf32>
    %36 = vector.extract_strided_slice %2 {offsets = [0, 8], sizes = [16, 8], strides = [1, 1]} : vector<16x96xf32> to vector<16x8xf32>
    %37 = vector.shape_cast %36 : vector<16x8xf32> to vector<2x8x8xf32>
    %38 = vector.extract_strided_slice %2 {offsets = [0, 40], sizes = [16, 8], strides = [1, 1]} : vector<16x96xf32> to vector<16x8xf32>
    %39 = vector.shape_cast %38 : vector<16x8xf32> to vector<2x8x8xf32>
    %40 = vector.extract_strided_slice %2 {offsets = [0, 72], sizes = [16, 8], strides = [1, 1]} : vector<16x96xf32> to vector<16x8xf32>
    %41 = vector.shape_cast %40 : vector<16x8xf32> to vector<2x8x8xf32>
    "tpu.trace_start"() <{level = 10 : i32, message = "bqd,bkd->bqk"}> : () -> ()
    %cst_14 = arith.constant dense<0.000000e+00> : vector<2x8x8xf32>
    %42 = tpu.matmul %37, %39, %cst_14 {dimension_numbers = #tpu.dot_dimension_numbers<[2], [2], [1], [1], [0, 0, 0, 1, 1, 1], [0], [0]>} : vector<2x8x8xf32>, vector<2x8x8xf32>, vector<2x8x8xf32> -> vector<2x8x8xf32>
    "tpu.trace_stop"() : () -> ()
    %cst_15 = arith.constant 0.353553385 : f32
    %43 = vector.broadcast %cst_15 : f32 to vector<2x8x8xf32>
    %44 = arith.mulf %42, %43 : vector<2x8x8xf32>
    %cst_16 = arith.constant -1.000000e+30 : f32
    %45 = vector.broadcast %cst_16 : f32 to vector<2x8x8xf32>
    %46 = arith.select %6, %45, %44 : vector<2x8x8xi1>, vector<2x8x8xf32>
    %cst_17 = arith.constant dense<0xFF800000> : vector<2x8xf32>
    %47 = vector.multi_reduction <maximumf>, %46, %cst_17 [2] : vector<2x8x8xf32> to vector<2x8xf32>
    %48 = vector.shape_cast %47 : vector<2x8xf32> to vector<2x8x1xf32>
    %49 = vector.broadcast %48 : vector<2x8x1xf32> to vector<2x8x8xf32>
    %50 = arith.subf %46, %49 : vector<2x8x8xf32>
    %51 = math.exp %50 : vector<2x8x8xf32>
    %cst_18 = arith.constant dense<0.000000e+00> : vector<2x8xf32>
    %52 = vector.multi_reduction <add>, %51, %cst_18 [2] : vector<2x8x8xf32> to vector<2x8xf32>
    %53 = vector.shape_cast %52 : vector<2x8xf32> to vector<2x8x1xf32>
    %54 = tpu.reciprocal %53 {approx = true} : vector<2x8x1xf32> -> vector<2x8x1xf32>
    %55 = vector.broadcast %54 : vector<2x8x1xf32> to vector<2x8x8xf32>
    %56 = arith.mulf %51, %55 : vector<2x8x8xf32>
    "tpu.trace_start"() <{level = 10 : i32, message = "bqk,bkd->bqd"}> : () -> ()
    %cst_19 = arith.constant dense<0.000000e+00> : vector<2x8x8xf32>
    %57 = tpu.matmul %56, %41, %cst_19 {dimension_numbers = #tpu.dot_dimension_numbers<[2], [1], [1], [2], [0, 0, 0, 1, 1, 2], [0], [0]>} : vector<2x8x8xf32>, vector<2x8x8xf32>, vector<2x8x8xf32> -> vector<2x8x8xf32>
    "tpu.trace_stop"() : () -> ()
    %58 = vector.shape_cast %57 : vector<2x8x8xf32> to vector<16x8xf32>
    %59 = vector.extract_strided_slice %3 {offsets = [8, 0], sizes = [8, 32], strides = [1, 1]} : vector<32x32xf32> to vector<8x32xf32>
    %cst_20 = arith.constant dense<0.000000e+00> : vector<16x32xf32>
    %60 = tpu.matmul %58, %59, %cst_20 {dimension_numbers = #tpu.dot_dimension_numbers<[1], [0], [0], [1], [0, 0, 1, 1], [], []>} : vector<16x8xf32>, vector<8x32xf32>, vector<16x32xf32> -> vector<16x32xf32>
    %61 = arith.addf %35, %60 : vector<16x32xf32>
    %62 = vector.extract_strided_slice %2 {offsets = [0, 16], sizes = [16, 8], strides = [1, 1]} : vector<16x96xf32> to vector<16x8xf32>
    %63 = vector.shape_cast %62 : vector<16x8xf32> to vector<2x8x8xf32>
    %64 = vector.extract_strided_slice %2 {offsets = [0, 48], sizes = [16, 8], strides = [1, 1]} : vector<16x96xf32> to vector<16x8xf32>
    %65 = vector.shape_cast %64 : vector<16x8xf32> to vector<2x8x8xf32>
    %66 = vector.extract_strided_slice %2 {offsets = [0, 80], sizes = [16, 8], strides = [1, 1]} : vector<16x96xf32> to vector<16x8xf32>
    %67 = vector.shape_cast %66 : vector<16x8xf32> to vector<2x8x8xf32>
    "tpu.trace_start"() <{level = 10 : i32, message = "bqd,bkd->bqk"}> : () -> ()
    %cst_21 = arith.constant dense<0.000000e+00> : vector<2x8x8xf32>
    %68 = tpu.matmul %63, %65, %cst_21 {dimension_numbers = #tpu.dot_dimension_numbers<[2], [2], [1], [1], [0, 0, 0, 1, 1, 1], [0], [0]>} : vector<2x8x8xf32>, vector<2x8x8xf32>, vector<2x8x8xf32> -> vector<2x8x8xf32>
    "tpu.trace_stop"() : () -> ()
    %cst_22 = arith.constant 0.353553385 : f32
    %69 = vector.broadcast %cst_22 : f32 to vector<2x8x8xf32>
    %70 = arith.mulf %68, %69 : vector<2x8x8xf32>
    %cst_23 = arith.constant -1.000000e+30 : f32
    %71 = vector.broadcast %cst_23 : f32 to vector<2x8x8xf32>
    %72 = arith.select %6, %71, %70 : vector<2x8x8xi1>, vector<2x8x8xf32>
    %cst_24 = arith.constant dense<0xFF800000> : vector<2x8xf32>
    %73 = vector.multi_reduction <maximumf>, %72, %cst_24 [2] : vector<2x8x8xf32> to vector<2x8xf32>
    %74 = vector.shape_cast %73 : vector<2x8xf32> to vector<2x8x1xf32>
    %75 = vector.broadcast %74 : vector<2x8x1xf32> to vector<2x8x8xf32>
    %76 = arith.subf %72, %75 : vector<2x8x8xf32>
    %77 = math.exp %76 : vector<2x8x8xf32>
    %cst_25 = arith.constant dense<0.000000e+00> : vector<2x8xf32>
    %78 = vector.multi_reduction <add>, %77, %cst_25 [2] : vector<2x8x8xf32> to vector<2x8xf32>
    %79 = vector.shape_cast %78 : vector<2x8xf32> to vector<2x8x1xf32>
    %80 = tpu.reciprocal %79 {approx = true} : vector<2x8x1xf32> -> vector<2x8x1xf32>
    %81 = vector.broadcast %80 : vector<2x8x1xf32> to vector<2x8x8xf32>
    %82 = arith.mulf %77, %81 : vector<2x8x8xf32>
    "tpu.trace_start"() <{level = 10 : i32, message = "bqk,bkd->bqd"}> : () -> ()
    %cst_26 = arith.constant dense<0.000000e+00> : vector<2x8x8xf32>
    %83 = tpu.matmul %82, %67, %cst_26 {dimension_numbers = #tpu.dot_dimension_numbers<[2], [1], [1], [2], [0, 0, 0, 1, 1, 2], [0], [0]>} : vector<2x8x8xf32>, vector<2x8x8xf32>, vector<2x8x8xf32> -> vector<2x8x8xf32>
    "tpu.trace_stop"() : () -> ()
    %84 = vector.shape_cast %83 : vector<2x8x8xf32> to vector<16x8xf32>
    %85 = vector.extract_strided_slice %3 {offsets = [16, 0], sizes = [8, 32], strides = [1, 1]} : vector<32x32xf32> to vector<8x32xf32>
    %cst_27 = arith.constant dense<0.000000e+00> : vector<16x32xf32>
    %86 = tpu.matmul %84, %85, %cst_27 {dimension_numbers = #tpu.dot_dimension_numbers<[1], [0], [0], [1], [0, 0, 1, 1], [], []>} : vector<16x8xf32>, vector<8x32xf32>, vector<16x32xf32> -> vector<16x32xf32>
    %87 = arith.addf %61, %86 : vector<16x32xf32>
    %88 = vector.extract_strided_slice %2 {offsets = [0, 24], sizes = [16, 8], strides = [1, 1]} : vector<16x96xf32> to vector<16x8xf32>
    %89 = vector.shape_cast %88 : vector<16x8xf32> to vector<2x8x8xf32>
    %90 = vector.extract_strided_slice %2 {offsets = [0, 56], sizes = [16, 8], strides = [1, 1]} : vector<16x96xf32> to vector<16x8xf32>
    %91 = vector.shape_cast %90 : vector<16x8xf32> to vector<2x8x8xf32>
    %92 = vector.extract_strided_slice %2 {offsets = [0, 88], sizes = [16, 8], strides = [1, 1]} : vector<16x96xf32> to vector<16x8xf32>
    %93 = vector.shape_cast %92 : vector<16x8xf32> to vector<2x8x8xf32>
    "tpu.trace_start"() <{level = 10 : i32, message = "bqd,bkd->bqk"}> : () -> ()
    %cst_28 = arith.constant dense<0.000000e+00> : vector<2x8x8xf32>
    %94 = tpu.matmul %89, %91, %cst_28 {dimension_numbers = #tpu.dot_dimension_numbers<[2], [2], [1], [1], [0, 0, 0, 1, 1, 1], [0], [0]>} : vector<2x8x8xf32>, vector<2x8x8xf32>, vector<2x8x8xf32> -> vector<2x8x8xf32>
    "tpu.trace_stop"() : () -> ()
    %cst_29 = arith.constant 0.353553385 : f32
    %95 = vector.broadcast %cst_29 : f32 to vector<2x8x8xf32>
    %96 = arith.mulf %94, %95 : vector<2x8x8xf32>
    %cst_30 = arith.constant -1.000000e+30 : f32
    %97 = vector.broadcast %cst_30 : f32 to vector<2x8x8xf32>
    %98 = arith.select %6, %97, %96 : vector<2x8x8xi1>, vector<2x8x8xf32>
    %cst_31 = arith.constant dense<0xFF800000> : vector<2x8xf32>
    %99 = vector.multi_reduction <maximumf>, %98, %cst_31 [2] : vector<2x8x8xf32> to vector<2x8xf32>
    %100 = vector.shape_cast %99 : vector<2x8xf32> to vector<2x8x1xf32>
    %101 = vector.broadcast %100 : vector<2x8x1xf32> to vector<2x8x8xf32>
    %102 = arith.subf %98, %101 : vector<2x8x8xf32>
    %103 = math.exp %102 : vector<2x8x8xf32>
    %cst_32 = arith.constant dense<0.000000e+00> : vector<2x8xf32>
    %104 = vector.multi_reduction <add>, %103, %cst_32 [2] : vector<2x8x8xf32> to vector<2x8xf32>
    %105 = vector.shape_cast %104 : vector<2x8xf32> to vector<2x8x1xf32>
    %106 = tpu.reciprocal %105 {approx = true} : vector<2x8x1xf32> -> vector<2x8x1xf32>
    %107 = vector.broadcast %106 : vector<2x8x1xf32> to vector<2x8x8xf32>
    %108 = arith.mulf %103, %107 : vector<2x8x8xf32>
    "tpu.trace_start"() <{level = 10 : i32, message = "bqk,bkd->bqd"}> : () -> ()
    %cst_33 = arith.constant dense<0.000000e+00> : vector<2x8x8xf32>
    %109 = tpu.matmul %108, %93, %cst_33 {dimension_numbers = #tpu.dot_dimension_numbers<[2], [1], [1], [2], [0, 0, 0, 1, 1, 2], [0], [0]>} : vector<2x8x8xf32>, vector<2x8x8xf32>, vector<2x8x8xf32> -> vector<2x8x8xf32>
    "tpu.trace_stop"() : () -> ()
    %110 = vector.shape_cast %109 : vector<2x8x8xf32> to vector<16x8xf32>
    %111 = vector.extract_strided_slice %3 {offsets = [24, 0], sizes = [8, 32], strides = [1, 1]} : vector<32x32xf32> to vector<8x32xf32>
    %cst_34 = arith.constant dense<0.000000e+00> : vector<16x32xf32>
    %112 = tpu.matmul %110, %111, %cst_34 {dimension_numbers = #tpu.dot_dimension_numbers<[1], [0], [0], [1], [0, 0, 1, 1], [], []>} : vector<16x8xf32>, vector<8x32xf32>, vector<16x32xf32> -> vector<16x32xf32>
    %113 = arith.addf %87, %112 : vector<16x32xf32>
    %c0_35 = arith.constant 0 : index
    %c0_36 = arith.constant 0 : index
    %114 = vector.load %arg5[%c0_35, %c0_36] : memref<16x32xf32, #tpu.memory_space<vmem>>, vector<16x32xf32>
    tpu.vector_store %arg5[%c0_35, %c0_36], %113 {strides = array<i32>} : memref<16x32xf32, #tpu.memory_space<vmem>>, vector<16x32xf32>,
    return
  }
  func.func @transform_0(%arg0: i32) -> (i32, i32) {
    %c0_i32 = arith.constant 0 : i32
    %c0_i32_0 = arith.constant 0 : i32
    %c0_i32_1 = arith.constant 0 : i32
    return %c0_i32, %c0_i32_0 : i32, i32
  }
  func.func @transform_1(%arg0: i32) -> (i32, i32) {
    %c0_i32 = arith.constant 0 : i32
    %c0_i32_0 = arith.constant 0 : i32
    %c0_i32_1 = arith.constant 0 : i32
    return %c0_i32, %c0_i32_0 : i32, i32
  }
  func.func @transform_2(%arg0: i32) -> (i32, i32) {
    %c0_i32 = arith.constant 0 : i32
    %c0_i32_0 = arith.constant 0 : i32
    %c0_i32_1 = arith.constant 0 : i32
    return %c0_i32, %c0_i32_0 : i32, i32
  }
  func.func @transform_3(%arg0: i32) -> (i32, i32) {
    %c0_i32 = arith.constant 0 : i32
    %c0_i32_0 = arith.constant 0 : i32
    %c0_i32_1 = arith.constant 0 : i32
    return %c0_i32, %c0_i32_0 : i32, i32
  }
  func.func @transform_4(%arg0: i32) -> (i32, i32) {
    %c0_i32 = arith.constant 0 : i32
    %c0_i32_0 = arith.constant 0 : i32
    %c0_i32_1 = arith.constant 0 : i32
    return %c0_i32, %c0_i32_0 : i32, i32
  }
}

</mosaic_0001>

<bundles_post_ra>
// kernel: tpu_custom_call.1
= control target key start
LH: loop header
LB: loop body
LE: loop exit
PB: predicated region body
PF: predicated region fallthrough
CT: control target
= control target key end

     0   :  { %9 = vsyncpa [#allocation3], 0  ;;  %s2475_s0 = inlined_call_operand.hbm [shape: f32[16,32], index: 0, kind: input, shape index: {}]   ;;  %s2476_s1 = inlined_call_operand.hbm [shape: f32[32,96], index: 1, kind: input, shape index: {}]   ;;  %s2477_s2 = inlined_call_operand.hbm [shape: f32[32,32], index: 2, kind: input, shape index: {}]   ;;  %s2478_s3 = inlined_call_operand.vmem [shape: f32[1,32], index: 3, kind: input, shape index: {}]   ;;  %s2479_s4 = inlined_call_operand.hbm [shape: f32[16,32], index: 4, kind: output, shape index: {}]  }
   0x1   :  { %10 = vsyncpa [#allocation6], 0 }
   0x2   :  { %11 = vsyncpa [#allocation4], 0  ;;  %s2207_s15 = smov [#allocation5]   ;;  %s2208_s17 = smov [#allocation2]  }
   0x3   :  { %s29_s16 = sshll.u32 %s2207_s15, 4  ;;  %s17_s18 = sshll.u32 %s2208_s17, 4  ;;  %s30_s16 = int_to_ptr.vmem [resolvable:$true] %s29_s16  ;;  %s2251_s18 = int_to_ptr.vmem [resolvable:$true] %s17_s18 }
   0x4   :  { %s2113_s21 = scalar_lea.hbm %s2476_s1, 512 }
   0x5   :  { %p2114_p0 = scmp.ne.s32.totalorder %s2476_s1, %s2113_s21  ;;  %p2117_p1 = scmp.lt.u32.totalorder %s2113_s21, %s2476_s1 }
   0x7   :  { %p2119_p2 = pnand %p2117_p1, %p2114_p0 }
   0x9   :  { %2122 = shalt.err (!%p2119_p2)
}
   0xa   :  { %s2123_s26 = scalar_lea.vmem %s30_s16, 512  ;;  %p2128_p4 = scmp.lt.s32.totalorder %s30_s16, %s30_s16 }
   0xb   :  { %p2124_p3 = scmp.ne.s32.totalorder %s30_s16, %s2123_s26  ;;  %p2129_p5 = scmp.lt.s32.totalorder %s2123_s26, %s2123_s26 }
   0xd   :  { %p2130_p6 = por %p2129_p5, %p2128_p4 }
   0xf   :  { %p2131_p7 = pnand %p2130_p6, %p2124_p3 }
  0x11   :  { %2134 = shalt.err (!%p2131_p7)
}
  0x12   :  { %s2209_s27 = smov 128   ;;  %s2210_s28 = smov 8  }
  0x13   :  { %35 = dma.hbm_to_vmem [thread:$0]  %s2476_s1, 512, %s30_s16, [#allocation6], %s2209_s27, %s2209_s27, %s2210_s28  }
  0x14   :  { %s2135_s7 = scalar_lea.hbm %s2475_s0, 256 }
  0x15   :  { %p2136_p8 = scmp.ne.s32.totalorder %s2475_s0, %s2135_s7  ;;  %p2139_p9 = scmp.lt.u32.totalorder %s2135_s7, %s2475_s0 }
  0x17   :  { %p2141_p10 = pnand %p2139_p9, %p2136_p8 }
  0x19   :  { %2144 = shalt.err (!%p2141_p10)
}
  0x1a   :  { %s2145_s12 = scalar_lea.vmem %s2251_s18, 256  ;;  %p2150_p12 = scmp.lt.s32.totalorder %s2251_s18, %s2251_s18 }
  0x1b   :  { %p2146_p11 = scmp.ne.s32.totalorder %s2251_s18, %s2145_s12  ;;  %p2151_p13 = scmp.lt.s32.totalorder %s2145_s12, %s2145_s12 }
  0x1d   :  { %p2152_p0 = por %p2151_p13, %p2150_p12 }
  0x1f   :  { %p2153_p1 = pnand %p2152_p0, %p2146_p11 }
  0x21   :  { %2156 = shalt.err (!%p2153_p1)
}
  0x22   :  { %23 = dma.hbm_to_vmem [thread:$0]  %s2475_s0, 256, %s2251_s18, [#allocation3], %s2209_s27, %s2209_s27, %s2210_s28  }
  0x23   :  { %s2211_s14 = smov [#allocation7]   ;;  %s2157_s19 = scalar_lea.hbm %s2477_s2, 512 }
  0x24   :  { %s41_s15 = sshll.u32 %s2211_s14, 4  ;;  %p2158_p2 = scmp.ne.s32.totalorder %s2477_s2, %s2157_s19  ;;  %s42_s15 = int_to_ptr.vmem [resolvable:$true] %s41_s15 }
  0x25   :  { %p2161_p3 = scmp.lt.u32.totalorder %s2157_s19, %s2477_s2 }
  0x27   :  { %p2163_p4 = pnand %p2161_p3, %p2158_p2 }
  0x29   :  { %2166 = shalt.err (!%p2163_p4)
}
  0x2a   :  { %s2167_s24 = scalar_lea.vmem %s42_s15, 512  ;;  %p2172_p6 = scmp.lt.s32.totalorder %s42_s15, %s42_s15 }
  0x2b   :  { %p2168_p5 = scmp.ne.s32.totalorder %s42_s15, %s2167_s24  ;;  %p2173_p7 = scmp.lt.s32.totalorder %s2167_s24, %s2167_s24 }
  0x2d   :  { %p2174_p8 = por %p2173_p7, %p2172_p6 }
  0x2f   :  { %p2175_p9 = pnand %p2174_p8, %p2168_p5 }
  0x31   :  { %2178 = shalt.err (!%p2175_p9)
}
  0x32   :  { %47 = dma.hbm_to_vmem [thread:$0]  %s2477_s2, 512, %s42_s15, [#allocation6], %s2209_s27, %s2209_s27, %s2210_s28  }
  0x33   :  { %2201 = dma.done.wait [#allocation3], 256  }
  0x34   :  { %2202 = vsyncadd [#allocation3], 4294967040 }
  0x35   :  { %2203 = dma.done.wait [#allocation6], 1024  }
  0x36   :  { %2204 = vsyncadd [#allocation6], 4294966272  ;;  %vm65_vm0 = vcmask 261120   ;;  %v61_v0 = vld [vmem:[#allocation5] sm:$0xff]  ;;  %v62_v1 = vld [vmem:[#allocation5 + $0x8] sm:$0xff]  ;;  %v2212_v8 = vmov 0.0   ;;  %v151_v13 = vlaneseq }
  0x37   :  { %v63_v2 = vld [vmem:[#allocation5 + $0x10] sm:$0xff]  ;;  %v2046_v3 = vpack.c.bf16 %v62_v1, %v61_v0  ;;  %v64_v4 = vld [vmem:[#allocation5 + $0x18] sm:$0xff]  ;;  %1946 = vmatprep.subr.mxu1 %v2212_v8  ;;  %vm2213_vm1 = vmmov 0   ;;  %s2214_s2 = smov 96   ;;  %vm166_vm2 = vcmask 64512   ;;  %s2215_s25 = smov 64  }
  0x38   :  { %v59_v5 = vld [vmem:[#allocation2] sm:$0xff]  ;;  %v2050_v6 = vpack.c.bf16 %v64_v4, %v63_v2  ;;  %v60_v7 = vld [vmem:[#allocation2 + $0x8] sm:$0xff]  ;;  %1948 = vmatprep.mubr.msk.f32.mxu1 %vm2213_vm1, %v2212_v8  ;;  %v152_v14 = vshrl.u32 %v151_v13, 7  ;;  %v154_v15 = vand.u32 127, %v151_v13  ;;  %s2216_s26 = smov 88   ;;  %s2217_s29 = smov 120  }
  0x39   :  { %1943 = vmatprep.mubr.msk.f32.mxu0 %vm65_vm0, %v59_v5  ;;  %2047 = vmatprep.subr.bf16.mxu0 %v2046_v3  ;;  %v147_v38 = vld [vmem:[#allocation7] sm:$0xff]  ;;  %s2218_s30 = smov 56   ;;  %s2219_s5 = smov 112  }
  0x3a   :  { %2049 = vmatpush3.bf16.msra.mxu0 %v2046_v3  ;;  %vm2326_vm3 = vcmp.gt.s32.totalorder %v154_v15, %v152_v14  ;;  %s2220_s6 = smov 80   ;;  %s2221_s7 = smov 48  }
  0x3b   :  { %2051 = vmatprep.subr.bf16.mxu0 %v2050_v6  ;;  %s2222_s8 = smov 72   ;;  %s2223_s9 = smov 104  }
  0x3c   :  { %s2224_s10 = smov 40   ;;  %s2225_s1 = smov [#allocation8]  }
  0x3d   :  { %s1837_s13 = sshll.u32 %s2225_s1, 4  ;;  %s1838_s13 = int_to_ptr.vmem [resolvable:$true] %s1837_s13 }
  0x3e   :  { %2053 = vmatpush3.bf16.msra.mxu0 %v2050_v6  ;;  %s2179_s14 = scalar_lea.vmem %s1838_s13, 256  ;;  %p2184_p11 = scmp.lt.s32.totalorder %s1838_s13, %s1838_s13 }
  0x3f   :  { %1966 = vmatprep.subr.mxu0 %v147_v38  ;;  %p2180_p10 = scmp.ne.s32.totalorder %s1838_s13, %s2179_s14  ;;  %p2185_p12 = scmp.lt.s32.totalorder %s2179_s14, %s2179_s14 }
  0x41   :  { %1944 = vmatmul.mubr.msk.f32.vlgmr.msra.gmra.mrb[0].mxu0 %vm65_vm0, %v60_v7  ;;  %p2186_p13 = por %p2185_p12, %p2184_p11 }
  0x42   :  { %1967 = vmatpush3.msra.mxu0 %v147_v38 }
  0x43   :  { %1976 = vmatprep.subr.mxu0 %v2212_v8  ;;  %p2187_p0 = pnand %p2186_p13, %p2180_p10 }
 0x114   :  { %v2308_v9 = vpop.f32.mrb[0].mxu0 }
 0x115   :  { %v2310_v10 = vpop.f32.mrb[1].mxu0 }
 0x116   :  { %164 = vrot.lane.b32.xlu0 %v2310_v10, %s2214_s2 }
 0x11a   :  { %242 = vrot.lane.b32.xlu0 %v2308_v9, %s2214_s2 }
 0x188   :  { %v165_v11 = vpop.permute.xlu0 %164 }
 0x189   :  { %1947 = vmatpush3.xpose.msk.msra.mxu1 %vm166_vm2, %v165_v11 }
 0x18a   :  { %1951 = vmatprep.subr.mxu1 %v2212_v8 }
 0x18c   :  { %1949 = vmatmul.mubr.msk.f32.vlgmr.msra.gmra.mrb[0].mxu1 %vm166_vm2, %v2310_v10  ;;  %v243_v12 = vpop.permute.xlu0 %242 }
 0x18d   :  { %1952 = vmatpush3.xpose.msk.msra.mxu1 %vm166_vm2, %v243_v12  ;;  %1953 = vmatprep.mubr.msk.f32.mxu1 %vm2213_vm1, %v2212_v8 }
 0x18e   :  { %1956 = vmatprep.subr.mxu1 %v2212_v8 }
 0x190   :  { %1954 = vmatmul.mubr.msk.f32.vlgmr.msra.gmra.mrb[2].mxu1 %vm166_vm2, %v2308_v9 }
 0x191   :  { %1958 = vmatprep.mubr.msk.f32.mxu1 %vm2213_vm1, %v2212_v8 }
 0x25f   :  { %v237_v16 = vpop.f32.mrb[0].mxu1 }
 0x260   :  { %v318_v18 = vmul.f32 0.35355338, %v237_v16  ;;  %v1950_v19 = vpop.f32.mrb[1].mxu1 }
 0x262   :  { %v320_v20 = vsel %vm2326_vm3, -1e+30, %v318_v18 }
 0x263   :  { %v314_v21 = vpop.f32.mrb[2].mxu1  ;;  %v322_v22 = vsel %vm166_vm2, %v320_v20, -inf }
 0x264   :  { %v319_v23 = vmul.f32 0.35355338, %v314_v21  ;;  %323 = vmax.xlane.f32.xlu1 %v322_v22  ;;  %v1955_v24 = vpop.f32.mrb[3].mxu1 }
 0x266   :  { %v321_v25 = vsel %vm2326_vm3, -1e+30, %v319_v23 }
 0x267   :  { %v325_v26 = vsel %vm166_vm2, %v321_v25, -inf }
 0x268   :  { %326 = vmax.xlane.f32.xlu1 %v325_v26 }
 0x279   :  { %344 = vrot.lane.b32.xlu1 %v2310_v10, %s2215_s25 }
 0x2f1   :  { %v324_v27 = vpop.xlane.xlu1 %323 }
 0x2f2   :  { %v328_v28 = vsub.f32 %v320_v20, %v324_v27 }
 0x2f4   :  { %v330_v29 = vmul.f32 1.442695, %v328_v28 }
 0x2f5   :  { %v327_v30 = vpop.xlane.xlu1 %326 }
 0x2f6   :  { %2081 = vpow2.f32 %v330_v29  ;;  %v329_v31 = vsub.f32 %v321_v25, %v327_v30 }
 0x2f8   :  { %v332_v32 = vmul.f32 1.442695, %v329_v31 }
 0x2f9   :  { %v345_v33 = vpop.permute.xlu1 %344 }
 0x2fa   :  { %2083 = vpow2.f32 %v332_v32  ;;  %1957 = vmatpush3.msra.mxu1 %v345_v33 }
 0x2fb   :  { %1961 = vmatprep.subr.mxu1 %v2212_v8 }
 0x300   :  { %v2082_v34 = vpop.eup %2081 }
 0x301   :  { %v334_v35 = vsel %vm166_vm2, %v2082_v34, 0.0 }
 0x302   :  { %335 = vadd.xlane.f32.xlu0 %v334_v35 }
 0x304   :  { %v2084_v36 = vpop.eup %2083 }
 0x305   :  { %v337_v37 = vsel %vm166_vm2, %v2084_v36, 0.0 }
 0x306   :  { %338 = vadd.xlane.f32.xlu1 %v337_v37 }
 0x317   :  { %420 = vrot.lane.b32.xlu1 %v2308_v9, %s2215_s25 }
 0x318   :  { %659 = vrot.lane.b32.xlu0 %v2308_v9, %s2216_s26 }
 0x31b   :  { %581 = vrot.lane.b32.xlu1 %v2310_v10, %s2216_s26 }
 0x31f   :  { %579 = vrot.lane.b32.xlu1 %v2310_v10, %s2217_s29 }
 0x323   :  { %657 = vrot.lane.b32.xlu1 %v2308_v9, %s2217_s29 }
 0x38f   :  { %v336_v39 = vpop.xlane.xlu0 %335 }
 0x390   :  { %2085 = vrcp.f32 %v336_v39  ;;  %v148_v39 = vld [vmem:[#allocation7 + $0x8] sm:$0xff] }
 0x393   :  { %v339_v40 = vpop.xlane.xlu1 %338  ;;  %v660_v51 = vpop.permute.xlu0 %659 }
 0x394   :  { %2087 = vrcp.f32 %v339_v40 }
 0x397   :  { %v421_v43 = vpop.permute.xlu1 %420 }
 0x39a   :  { %v2086_v41 = vpop.eup %2085 }
 0x39b   :  { %v342_v42 = vmul.f32 %v2086_v41, %v2082_v34  ;;  %v582_v46 = vpop.permute.xlu1 %581 }
 0x39d   :  { %1959 = vmatmul.mubr.msk.f32.vlgmr.msra.gmra.mrb[4].mxu1 %vm166_vm2, %v342_v42 }
 0x39e   :  { %v2088_v44 = vpop.eup %2087  ;;  %1962 = vmatpush3.msra.mxu1 %v421_v43  ;;  %1963 = vmatprep.mubr.msk.f32.mxu1 %vm2213_vm1, %v2212_v8 }
 0x39f   :  { %v343_v45 = vmul.f32 %v2088_v44, %v2084_v36  ;;  %1971 = vmatprep.subr.mxu1 %v2212_v8  ;;  %v580_v47 = vpop.permute.xlu1 %579 }
 0x3a1   :  { %1964 = vmatmul.mubr.msk.f32.vlgmr.msra.gmra.mrb[6].mxu1 %vm166_vm2, %v343_v45 }
 0x3a2   :  { %1973 = vmatprep.mubr.msk.f32.mxu1 %vm2213_vm1, %v2212_v8 }
 0x3a3   :  { %v658_v53 = vpop.permute.xlu1 %657 }
 0x3a5   :  { %1972 = vmatpush3.xpose.msk.msra.mxu1 %vm166_vm2, %v582_v46 }
 0x3a6   :  { %1981 = vmatprep.subr.mxu1 %v2212_v8 }
 0x3a8   :  { %1974 = vmatmul.mubr.msk.f32.vlgmr.msra.gmra.mrb[8].mxu1 %vm166_vm2, %v580_v47 }
 0x3a9   :  { %1983 = vmatprep.mubr.msk.f32.mxu1 %vm2213_vm1, %v2212_v8 }
 0x470   :  { %v416_v48 = vpop.f32.mrb[4].mxu1 }
 0x471   :  { %v1960_v49 = vpop.f32.mrb[5].mxu1  ;;  %1968 = vmatprep.mubr.msk.f32.mxu0 %vm166_vm2, %v416_v48 }
 0x474   :  { %v492_v50 = vpop.f32.mrb[6].mxu1 }
 0x475   :  { %v1965_v52 = vpop.f32.mrb[7].mxu1  ;;  %1969 = vmatmul.mubr.msk.f32.vlgmr.msra.gmra.mrb[2].mxu0 %vm166_vm2, %v492_v50 }
 0x476   :  { %1977 = vmatpush3.xpose.msk.msra.mxu0 %vm166_vm2, %v660_v51  ;;  %1978 = vmatprep.mubr.msk.f32.mxu0 %vm2213_vm1, %v2212_v8 }
 0x477   :  { %1986 = vmatprep.subr.mxu0 %v2212_v8 }
 0x479   :  { %1979 = vmatmul.mubr.msk.f32.vlgmr.msra.gmra.mrb[4].mxu0 %vm166_vm2, %v658_v53 }
 0x47a   :  { %1988 = vmatprep.mubr.msk.f32.mxu0 %vm2213_vm1, %v2212_v8 }
 0x47b   :  { %v653_v54 = vpop.f32.mrb[8].mxu1 }
 0x47c   :  { %v735_v55 = vmul.f32 0.35355338, %v653_v54  ;;  %v1975_v56 = vpop.f32.mrb[9].mxu1  ;;  %v149_v54 = vld [vmem:[#allocation7 + $0x10] sm:$0xff] }
 0x47e   :  { %v737_v57 = vsel %vm2326_vm3, -1e+30, %v735_v55 }
 0x47f   :  { %v739_v58 = vsel %vm166_vm2, %v737_v57, -inf }
 0x480   :  { %740 = vmax.xlane.f32.xlu1 %v739_v58 }
 0x491   :  { %761 = vrot.lane.b32.xlu1 %v2310_v10, %s2218_s30 }
 0x495   :  { %996 = vrot.lane.b32.xlu1 %v2310_v10, %s2219_s5 }
 0x499   :  { %1076 = vrot.lane.b32.xlu1 %v2308_v9, %s2220_s6 }
 0x49d   :  { %1074 = vrot.lane.b32.xlu1 %v2308_v9, %s2219_s5 }
 0x50d   :  { %v741_v59 = vpop.xlane.xlu1 %740 }
 0x50e   :  { %v745_v60 = vsub.f32 %v737_v57, %v741_v59 }
 0x510   :  { %v747_v61 = vmul.f32 1.442695, %v745_v60 }
 0x511   :  { %v762_v62 = vpop.permute.xlu1 %761 }
 0x512   :  { %2089 = vpow2.f32 %v747_v61  ;;  %1982 = vmatpush3.msra.mxu1 %v762_v62 }
 0x513   :  { %1996 = vmatprep.subr.mxu1 %v2212_v8 }
 0x515   :  { %v997_v7 = vpop.permute.xlu1 %996 }
 0x519   :  { %v1077_v14 = vpop.permute.xlu1 %1076 }
 0x51c   :  { %v2090_v63 = vpop.eup %2089 }
 0x51d   :  { %v751_v0 = vsel %vm166_vm2, %v2090_v63, 0.0  ;;  %v1075_v15 = vpop.permute.xlu1 %1074 }
 0x51e   :  { %752 = vadd.xlane.f32.xlu0 %v751_v0 }
 0x534   :  { %998 = vrot.lane.b32.xlu0 %v2310_v10, %s2220_s6 }
 0x54c   :  { %v731_v1 = vpop.f32.mrb[4].mxu0 }
 0x54d   :  { %v736_v2 = vmul.f32 0.35355338, %v731_v1  ;;  %v1980_v3 = vpop.f32.mrb[5].mxu0 }
 0x54f   :  { %v738_v4 = vsel %vm2326_vm3, -1e+30, %v736_v2 }
 0x550   :  { %v742_v5 = vsel %vm166_vm2, %v738_v4, -inf }
 0x551   :  { %743 = vmax.xlane.f32.xlu1 %v742_v5 }
 0x5ab   :  { %v753_v6 = vpop.xlane.xlu0 %752 }
 0x5ac   :  { %2091 = vrcp.f32 %v753_v6 }
 0x5af   :  { %v999_v13 = vpop.permute.xlu0 %998 }
 0x5b6   :  { %v2092_v11 = vpop.eup %2091 }
 0x5b7   :  { %v759_v12 = vmul.f32 %v2092_v11, %v2090_v63 }
 0x5b9   :  { %1984 = vmatmul.mubr.msk.f32.vlgmr.msra.gmra.mrb[10].mxu1 %vm166_vm2, %v759_v12 }
 0x5ba   :  { %1997 = vmatpush3.xpose.msk.msra.mxu1 %vm166_vm2, %v999_v13  ;;  %1998 = vmatprep.mubr.msk.f32.mxu1 %vm2213_vm1, %v2212_v8 }
 0x5bb   :  { %2001 = vmatprep.subr.mxu1 %v2212_v8 }
 0x5bd   :  { %1999 = vmatmul.mubr.msk.f32.vlgmr.msra.gmra.mrb[12].mxu1 %vm166_vm2, %v997_v7 }
 0x5be   :  { %2002 = vmatpush3.xpose.msk.msra.mxu1 %vm166_vm2, %v1077_v14  ;;  %2003 = vmatprep.mubr.msk.f32.mxu1 %vm2213_vm1, %v2212_v8 }
 0x5bf   :  { %2011 = vmatprep.subr.mxu1 %v2212_v8 }
 0x5c1   :  { %2004 = vmatmul.mubr.msk.f32.vlgmr.msra.gmra.mrb[14].mxu1 %vm166_vm2, %v1075_v15 }
 0x5c2   :  { %2013 = vmatprep.mubr.msk.f32.mxu1 %vm2213_vm1, %v2212_v8 }
 0x5de   :  { %v744_v16 = vpop.xlane.xlu1 %743 }
 0x5df   :  { %v746_v18 = vsub.f32 %v738_v4, %v744_v16 }
 0x5e1   :  { %v749_v19 = vmul.f32 1.442695, %v746_v18 }
 0x5e3   :  { %2093 = vpow2.f32 %v749_v19 }
 0x5ed   :  { %v2094_v20 = vpop.eup %2093 }
 0x5ee   :  { %v754_v21 = vsel %vm166_vm2, %v2094_v20, 0.0 }
 0x5ef   :  { %755 = vadd.xlane.f32.xlu0 %v754_v21 }
 0x605   :  { %837 = vrot.lane.b32.xlu0 %v2308_v9, %s2218_s30 }
 0x609   :  { %1254 = vrot.lane.b32.xlu0 %v2308_v9, %s2221_s7 }
 0x60d   :  { %1415 = vrot.lane.b32.xlu0 %v2310_v10, %s2222_s8 }
 0x611   :  { %1493 = vrot.lane.b32.xlu0 %v2308_v9, %s2222_s8 }
 0x615   :  { %1413 = vrot.lane.b32.xlu0 %v2310_v10, %s2223_s9 }
 0x67c   :  { %v756_v22 = vpop.xlane.xlu0 %755 }
 0x67d   :  { %2095 = vrcp.f32 %v756_v22 }
 0x680   :  { %v838_v23 = vpop.permute.xlu0 %837 }
 0x681   :  { %1987 = vmatpush3.msra.mxu0 %v838_v23 }
 0x682   :  { %1991 = vmatprep.subr.mxu0 %v148_v39 }
 0x684   :  { %v1255_v24 = vpop.permute.xlu0 %1254 }
 0x685   :  { %2012 = vmatpush3.msra.mxu1 %v1255_v24 }
 0x686   :  { %2021 = vmatprep.subr.mxu1 %v2212_v8 }
 0x687   :  { %v2096_v25 = vpop.eup %2095 }
 0x688   :  { %v760_v26 = vmul.f32 %v2096_v25, %v2094_v20  ;;  %v1416_v56 = vpop.permute.xlu0 %1415 }
 0x68a   :  { %1989 = vmatmul.mubr.msk.f32.vlgmr.msra.gmra.mrb[6].mxu0 %vm166_vm2, %v760_v26 }
 0x68b   :  { %1992 = vmatpush3.msra.mxu0 %v148_v39 }
 0x68c   :  { %v833_v27 = vpop.f32.mrb[10].mxu1  ;;  %2006 = vmatprep.subr.mxu0 %v2212_v8  ;;  %v1494_v60 = vpop.permute.xlu0 %1493 }
 0x68d   :  { %v1985_v28 = vpop.f32.mrb[11].mxu1  ;;  %1993 = vmatprep.mubr.msk.f32.mxu0 %vm166_vm2, %v833_v27 }
 0x690   :  { %v1070_v29 = vpop.f32.mrb[12].mxu1  ;;  %v1414_v62 = vpop.permute.xlu0 %1413 }
 0x691   :  { %v1152_v30 = vmul.f32 0.35355338, %v1070_v29  ;;  %v2000_v31 = vpop.f32.mrb[13].mxu1 }
 0x693   :  { %v1154_v32 = vsel %vm2326_vm3, -1e+30, %v1152_v30 }
 0x694   :  { %v1148_v33 = vpop.f32.mrb[14].mxu1  ;;  %v1156_v34 = vsel %vm166_vm2, %v1154_v32, -inf }
 0x695   :  { %v1153_v35 = vmul.f32 0.35355338, %v1148_v33  ;;  %1157 = vmax.xlane.f32.xlu1 %v1156_v34  ;;  %v2005_v36 = vpop.f32.mrb[15].mxu1 }
 0x697   :  { %v1155_v37 = vsel %vm2326_vm3, -1e+30, %v1153_v35 }
 0x698   :  { %v1159_v38 = vsel %vm166_vm2, %v1155_v37, -inf }
 0x699   :  { %1160 = vmax.xlane.f32.xlu1 %v1159_v38 }
 0x722   :  { %v1158_v40 = vpop.xlane.xlu1 %1157 }
 0x723   :  { %v1162_v41 = vsub.f32 %v1154_v32, %v1158_v40 }
 0x725   :  { %v1164_v42 = vmul.f32 1.442695, %v1162_v41 }
 0x726   :  { %v1161_v43 = vpop.xlane.xlu1 %1160 }
 0x727   :  { %2097 = vpow2.f32 %v1164_v42  ;;  %v1163_v44 = vsub.f32 %v1155_v37, %v1161_v43 }
 0x729   :  { %v1166_v45 = vmul.f32 1.442695, %v1163_v44 }
 0x72b   :  { %2099 = vpow2.f32 %v1166_v45 }
 0x731   :  { %v2098_v46 = vpop.eup %2097 }
 0x732   :  { %v1168_v47 = vsel %vm166_vm2, %v2098_v46, 0.0 }
 0x733   :  { %1169 = vadd.xlane.f32.xlu1 %v1168_v47 }
 0x735   :  { %v2100_v48 = vpop.eup %2099 }
 0x736   :  { %v1171_v49 = vsel %vm166_vm2, %v2100_v48, 0.0 }
 0x737   :  { %1172 = vadd.xlane.f32.xlu1 %v1171_v49 }
 0x748   :  { %1178 = vrot.lane.b32.xlu1 %v2310_v10, %s2221_s7 }
 0x74c   :  { %1491 = vrot.lane.b32.xlu1 %v2308_v9, %s2223_s9 }
 0x75d   :  { %v909_v50 = vpop.f32.mrb[6].mxu0 }
 0x75e   :  { %v1990_v51 = vpop.f32.mrb[7].mxu0  ;;  %1994 = vmatmul.mubr.msk.f32.vlgmr.msra.gmra.mrb[2].mxu0 %vm166_vm2, %v909_v50 }
 0x75f   :  { %2008 = vmatprep.mubr.msk.f32.mxu0 %vm2213_vm1, %v2212_v8 }
 0x7c0   :  { %v1170_v52 = vpop.xlane.xlu1 %1169 }
 0x7c1   :  { %2101 = vrcp.f32 %v1170_v52 }
 0x7c4   :  { %v1173_v53 = vpop.xlane.xlu1 %1172 }
 0x7c5   :  { %2103 = vrcp.f32 %v1173_v53 }
 0x7c8   :  { %v1179_v55 = vpop.permute.xlu1 %1178 }
 0x7c9   :  { %2007 = vmatpush3.msra.mxu0 %v1179_v55 }
 0x7ca   :  { %2016 = vmatprep.subr.mxu0 %v149_v54 }
 0x7cb   :  { %v2102_v57 = vpop.eup %2101 }
 0x7cc   :  { %v1176_v58 = vmul.f32 %v2102_v57, %v2098_v46  ;;  %v1492_v3 = vpop.permute.xlu1 %1491 }
 0x7ce   :  { %2009 = vmatmul.mubr.msk.f32.vlgmr.msra.gmra.mrb[8].mxu0 %vm166_vm2, %v1176_v58 }
 0x7cf   :  { %v2104_v59 = vpop.eup %2103  ;;  %2017 = vmatpush3.msra.mxu0 %v149_v54 }
 0x7d0   :  { %v1177_v61 = vmul.f32 %v2104_v59, %v2100_v48  ;;  %2026 = vmatprep.subr.mxu0 %v2212_v8 }
 0x7d2   :  { %2014 = vmatmul.mubr.msk.f32.vlgmr.msra.gmra.mrb[16].mxu1 %vm166_vm2, %v1177_v61 }
 0x7d3   :  { %2022 = vmatpush3.xpose.msk.msra.mxu1 %vm166_vm2, %v1416_v56  ;;  %2023 = vmatprep.mubr.msk.f32.mxu1 %vm2213_vm1, %v2212_v8 }
 0x7d4   :  { %2031 = vmatprep.subr.mxu1 %v2212_v8 }
 0x7d6   :  { %2024 = vmatmul.mubr.msk.f32.vlgmr.msra.gmra.mrb[18].mxu1 %vm166_vm2, %v1414_v62 }
 0x7d7   :  { %2033 = vmatprep.mubr.msk.f32.mxu1 %vm2213_vm1, %v2212_v8 }
 0x8a1   :  { %v1250_v63 = vpop.f32.mrb[8].mxu0 }
 0x8a2   :  { %v2010_v0 = vpop.f32.mrb[9].mxu0  ;;  %2018 = vmatprep.mubr.msk.f32.mxu0 %vm166_vm2, %v1250_v63 }
 0x8a5   :  { %v1326_v1 = vpop.f32.mrb[16].mxu1 }
 0x8a6   :  { %v2015_v2 = vpop.f32.mrb[17].mxu1  ;;  %2019 = vmatmul.mubr.msk.f32.vlgmr.msra.gmra.mrb[2].mxu0 %vm166_vm2, %v1326_v1 }
 0x8a7   :  { %2027 = vmatpush3.xpose.msk.msra.mxu0 %vm166_vm2, %v1494_v60  ;;  %2028 = vmatprep.mubr.msk.f32.mxu0 %vm2213_vm1, %v2212_v8 }
 0x8a8   :  { %2036 = vmatprep.subr.mxu0 %v2212_v8 }
 0x8a9   :  { %v1487_v4 = vpop.f32.mrb[18].mxu1 }
 0x8aa   :  { %v1569_v5 = vmul.f32 0.35355338, %v1487_v4  ;;  %v2025_v6 = vpop.f32.mrb[19].mxu1  ;;  %2029 = vmatmul.mubr.msk.f32.vlgmr.msra.gmra.mrb[10].mxu0 %vm166_vm2, %v1492_v3 }
 0x8ab   :  { %2038 = vmatprep.mubr.msk.f32.mxu0 %vm2213_vm1, %v2212_v8 }
 0x8ac   :  { %v1571_v7 = vsel %vm2326_vm3, -1e+30, %v1569_v5 }
 0x8ad   :  { %v1573_v11 = vsel %vm166_vm2, %v1571_v7, -inf }
 0x8ae   :  { %1574 = vmax.xlane.f32.xlu0 %v1573_v11 }
 0x93b   :  { %v1575_v12 = vpop.xlane.xlu0 %1574 }
 0x93c   :  { %v1579_v13 = vsub.f32 %v1571_v7, %v1575_v12 }
 0x93e   :  { %v1581_v14 = vmul.f32 1.442695, %v1579_v13 }
 0x940   :  { %2105 = vpow2.f32 %v1581_v14 }
 0x94a   :  { %v2106_v15 = vpop.eup %2105 }
 0x94b   :  { %v1585_v16 = vsel %vm166_vm2, %v2106_v15, 0.0 }
 0x94c   :  { %1586 = vadd.xlane.f32.xlu0 %v1585_v16 }
 0x97d   :  { %v1565_v18 = vpop.f32.mrb[10].mxu0 }
 0x97e   :  { %v1570_v19 = vmul.f32 0.35355338, %v1565_v18  ;;  %v2030_v20 = vpop.f32.mrb[11].mxu0 }
 0x980   :  { %v1572_v8 = vsel %vm2326_vm3, -1e+30, %v1570_v19 }
 0x981   :  { %v1576_v21 = vsel %vm166_vm2, %v1572_v8, -inf }
 0x982   :  { %1577 = vmax.xlane.f32.xlu1 %v1576_v21 }
 0x993   :  { %1595 = vrot.lane.b32.xlu1 %v2310_v10, %s2224_s10  ;;  %v150_v10 = vld [vmem:[#allocation7 + $0x18] sm:$0xff] }
 0x9d9   :  { %v1587_v22 = vpop.xlane.xlu0 %1586 }
 0x9da   :  { %2107 = vrcp.f32 %v1587_v22 }
 0x9e4   :  { %v2108_v24 = vpop.eup %2107 }
 0x9e5   :  { %v1593_v27 = vmul.f32 %v2108_v24, %v2106_v15 }
 0xa0f   :  { %v1578_v23 = vpop.xlane.xlu1 %1577 }
 0xa10   :  { %v1580_v25 = vsub.f32 %v1572_v8, %v1578_v23 }
 0xa12   :  { %v1583_v26 = vmul.f32 1.442695, %v1580_v25 }
 0xa13   :  { %v1596_v28 = vpop.permute.xlu1 %1595 }
 0xa14   :  { %2109 = vpow2.f32 %v1583_v26  ;;  %2032 = vmatpush3.msra.mxu1 %v1596_v28 }
 0xa15   :  { %2034 = vmatmul.mubr.msk.f32.vlgmr.msra.gmra.mrb[20].mxu1 %vm166_vm2, %v1593_v27 }
 0xa1e   :  { %v2110_v17 = vpop.eup %2109 }
 0xa1f   :  { %v1588_v29 = vsel %vm166_vm2, %v2110_v17, 0.0 }
 0xa20   :  { %1589 = vadd.xlane.f32.xlu0 %v1588_v29 }
 0xa36   :  { %1671 = vrot.lane.b32.xlu0 %v2308_v9, %s2224_s10  ;;  %v1852_v9 = vld [vmem:[%s2478_s3] ss:$0 sm:$0xff] }
 0xaad   :  { %v1590_v30 = vpop.xlane.xlu0 %1589 }
 0xaae   :  { %2111 = vrcp.f32 %v1590_v30 }
 0xab1   :  { %v1672_v31 = vpop.permute.xlu0 %1671 }
 0xab2   :  { %2037 = vmatpush3.msra.mxu0 %v1672_v31 }
 0xab3   :  { %2041 = vmatprep.subr.mxu0 %v150_v10 }
 0xab8   :  { %v2112_v32 = vpop.eup %2111 }
 0xab9   :  { %v1594_v33 = vmul.f32 %v2112_v32, %v2110_v17 }
 0xabb   :  { %2039 = vmatmul.mubr.msk.f32.vlgmr.msra.gmra.mrb[12].mxu0 %vm166_vm2, %v1594_v33 }
 0xabc   :  { %2042 = vmatpush3.msra.mxu0 %v150_v10 }
 0xae8   :  { %v1667_v34 = vpop.f32.mrb[20].mxu1 }
 0xae9   :  { %v2035_v35 = vpop.f32.mrb[21].mxu1  ;;  %2043 = vmatprep.mubr.msk.f32.mxu0 %vm166_vm2, %v1667_v34 }
 0xb8e   :  { %v1743_v36 = vpop.f32.mrb[12].mxu0 }
 0xb8f   :  { %v2040_v37 = vpop.f32.mrb[13].mxu0  ;;  %2044 = vmatmul.mubr.msk.f32.vlgmr.msra.gmra.mrb[2].mxu0 %vm166_vm2, %v1743_v36 }
 0xc62   :  { %v2045_v38 = vpop.f32.mrb[2].mxu0 }
 0xc63   :  { %v2054_v39 = vadd.f32 %v2045_v38, %v1852_v9  ;;  %v1819_v40 = vpop.f32.mrb[3].mxu0 }
 0xc64   :  { %v2055_v41 = vadd.f32 %v1852_v9, %v1819_v40 }
 0xc65   :  { %1831 = vst.msk [vmem:[#allocation8 + $0x8] sm:$0xff] %vm65_vm0, %v2054_v39 }
 0xc66   :  { %1830 = vst.msk [vmem:[#allocation8] sm:$0xff] %vm65_vm0, %v2055_v41 }
 0xc67   :  { %2190 = shalt.err (!%p2187_p0)
}
 0xc68   :  { %s2191_s16 = scalar_lea.hbm %s2479_s4, 256 }
 0xc69   :  { %p2192_p1 = scmp.ne.s32.totalorder %s2479_s4, %s2191_s16  ;;  %p2195_p2 = scmp.lt.u32.totalorder %s2191_s16, %s2479_s4 }
 0xc6b   :  { %p2197_p3 = pnand %p2195_p2, %p2192_p1 }
 0xc6d   :  { %2200 = shalt.err (!%p2197_p3)
}
 0xc6e   :  { %1843 = dma.vmem_to_hbm [thread:$0]  %s1838_s13, 256, %s2479_s4, [#allocation4], %s2209_s27, %s2209_s27, %s2210_s28  }
 0xc6f   :  { %2205 = dma.done.wait [#allocation4], 256  }
 0xc70   :  { %2206 = vsyncadd [#allocation4], 4294967040 }
 0xc71   :  { %1847 = vsyncpa [#allocation3], 1 }
 0xc72   :  { %1848 = vsyncpa [#allocation6], 1 }
 0xc73   :  { %1849 = vsyncpa [#allocation4], 1 }

</bundles_post_ra>
